<compile_context>
chip_gen: v7x
topology: tpu7x:2x2x1
jax: 0.10.0
libtpu: 0.0.40
codegen_flags: <defaults>
</compile_context>

<pallas_src>
import jax
import jax.numpy as jnp
from jax.experimental import pallas as pl
from jax.experimental.pallas import tpu as pltpu

_ALPHA = 0.47
_BETA = 0.5
_GAMMA = 0.09

_MIN_GRID_STEPS = 8              # pipelining depth + dual-TC sharding on v7x
_SINGLE_BLOCK_BYTES = 512 * 1024  # below this a single full-slab block is fine


def _poly_kernel(x_ref, o_ref):
    x = x_ref[...]
    # Horner form: one fewer multiply per vreg; computed in the native dtype.
    o_ref[...] = (_ALPHA + x * (_BETA + _GAMMA * x)).astype(o_ref.dtype)


def _block_budget():
    """(target block bytes, scoped VMEM limit) tuned per TPU generation."""
    try:
        kind = jax.devices()[0].device_kind.lower()
    except Exception:
        kind = ""
    if "v7" in kind:
        # ~3.2 TB/s HBM: larger blocks re-amortize the ~0.35us per-step cost.
        # 2 in + 2 out double-buffers at 8 MiB = 32 MiB < 48 MiB limit < 64 MiB VMEM.
        return 8 * 1024 * 1024, 48 * 1024 * 1024
    # v5e / v6e: 4 MiB blocks already sit on the ~85% HBM-roofline plateau.
    return 4 * 1024 * 1024, 32 * 1024 * 1024


def _choose_cols(n: int) -> int:
    """Largest lane-dense width (multiple of 128) dividing n that also keeps
    the slab sublane-dense (rows >= 8); fall back to 128."""
    for c in (4096, 2048, 1024, 512, 256, 128):
        if n % c == 0 and n // c >= 8:
            return c
    return 128


def _choose_row_tile(rows: int, cols: int, itemsize: int, target_bytes: int) -> int:
    slab_bytes = rows * cols * itemsize
    if rows <= 8 or slab_bytes <= _SINGLE_BLOCK_BYTES:
        return rows  # single full-extent block (legal even if rows % 8 != 0)
    max_tile = max(8, (target_bytes // (cols * itemsize)) // 8 * 8)
    # Largest tile that still yields >= _MIN_GRID_STEPS pipelined grid steps.
    ideal = pl.cdiv(pl.cdiv(rows, _MIN_GRID_STEPS), 8) * 8
    tile = min(max_tile, max(8, ideal))
    # Best effort: prefer an even step count so both v7x TensorCores stay busy.
    for cand in range(tile, max(8, tile - 64) - 1, -8):
        if pl.cdiv(rows, cand) % 2 == 0:
            return cand
    return tile


def polynome_act(x: jax.Array) -> jax.Array:
    """Elementwise 0.47 + 0.5*x + 0.09*x**2 for any shape / float dtype."""
    orig_shape = x.shape
    orig_dtype = x.dtype
    n = x.size
    itemsize = jnp.dtype(orig_dtype).itemsize

    target_bytes, vmem_limit = _block_budget()

    cols = _choose_cols(n)
    rows = pl.cdiv(n, cols)
    padded = rows * cols != n  # only for truly ragged n (n % 128 != 0)

    flat = x.reshape(-1)
    if padded:
        flat = jnp.pad(flat, (0, rows * cols - n))
    slab = flat.reshape(rows, cols)

    row_tile = _choose_row_tile(rows, cols, itemsize, target_bytes)
    grid = (pl.cdiv(rows, row_tile),)  # partial last block: edge writes masked

    out_slab = pl.pallas_call(
        _poly_kernel,
        out_shape=jax.ShapeDtypeStruct((rows, cols), orig_dtype),
        grid=grid,
        in_specs=[pl.BlockSpec((row_tile, cols), lambda i: (i, 0))],
        out_specs=pl.BlockSpec((row_tile, cols), lambda i: (i, 0)),
        compiler_params=pltpu.CompilerParams(
            dimension_semantics=("parallel",),
            vmem_limit_bytes=vmem_limit,
            # Let XLA fuse the (rare) pad producer into the input DMA instead
            # of materializing a padded copy in HBM.
            allow_input_fusion=[True] if padded else None,
        ),
    )(slab)

    if padded:
        return out_slab.reshape(-1)[:n].reshape(orig_shape)
    return out_slab.reshape(orig_shape)


def _ref(x):
    return 0.47 + 0.5 * x + 0.09 * x**2


if __name__ == "__main__":
    # 1) Small NCHW activation, consistent with the conv-net context.
    x = jax.random.normal(jax.random.PRNGKey(0), (2, 4, 16, 16), dtype=jnp.float32)
    out = polynome_act(x)
    jax.block_until_ready(out)
    assert out.shape == x.shape and out.dtype == x.dtype
    assert jnp.allclose(out, _ref(x), atol=1e-6, rtol=1e-6)

    # 2) Ragged / non-128-aligned size: pad + fused-input + tail-slice path.
    x2 = jax.random.normal(jax.random.PRNGKey(1), (3, 5, 7), dtype=jnp.float32)
    out2 = polynome_act(x2)
    jax.block_until_ready(out2)
    assert out2.shape == x2.shape and out2.dtype == x2.dtype
    assert jnp.allclose(out2, _ref(x2), atol=1e-6, rtol=1e-6)

    # 3) Mid-size input: multi-step grid with a partial (masked) edge block,
    #    no padding or tail-slice.
    x3 = jax.random.normal(jax.random.PRNGKey(2), (2, 32, 56, 56), dtype=jnp.float32)
    out3 = polynome_act(x3)
    jax.block_until_ready(out3)
    assert out3.shape == x3.shape and out3.dtype == x3.dtype
    assert jnp.allclose(out3, _ref(x3), atol=1e-6, rtol=1e-6)

    print("KERNEL_OK")
</pallas_src>

<mosaic_0001>
module attributes {stable_mosaic.version = 11 : i64} {
  func.func @_poly_kernel(%arg0: i32, %arg1: memref<8x256xf32, #tpu.memory_space<vmem>>, %arg2: memref<8x256xf32, #tpu.memory_space<vmem>>) attributes {dimension_semantics = [#tpu.dimension_semantics<parallel>], iteration_bounds = array<i64: 1>, scalar_prefetch = 0 : i64, scratch_operands = 0 : i64, tpu.core_type = #tpu.core_type<tc>, window_params = [{transform_indices = @transform_0, window_bounds = array<i64: 8, 256>}, {transform_indices = @transform_1, window_bounds = array<i64: 8, 256>}]} {
    %c0 = arith.constant 0 : index
    %c0_0 = arith.constant 0 : index
    %0 = vector.load %arg1[%c0, %c0_0] : memref<8x256xf32, #tpu.memory_space<vmem>>, vector<8x256xf32>
    %cst = arith.constant 9.000000e-02 : f32
    %1 = vector.broadcast %cst : f32 to vector<8x256xf32>
    %2 = arith.mulf %1, %0 : vector<8x256xf32>
    %cst_1 = arith.constant 5.000000e-01 : f32
    %3 = vector.broadcast %cst_1 : f32 to vector<8x256xf32>
    %4 = arith.addf %3, %2 : vector<8x256xf32>
    %5 = arith.mulf %0, %4 : vector<8x256xf32>
    %cst_2 = arith.constant 4.700000e-01 : f32
    %6 = vector.broadcast %cst_2 : f32 to vector<8x256xf32>
    %7 = arith.addf %6, %5 : vector<8x256xf32>
    %c0_3 = arith.constant 0 : index
    %c0_4 = arith.constant 0 : index
    %8 = vector.load %arg2[%c0_3, %c0_4] : memref<8x256xf32, #tpu.memory_space<vmem>>, vector<8x256xf32>
    tpu.vector_store %arg2[%c0_3, %c0_4], %7 {strides = array<i32>} : memref<8x256xf32, #tpu.memory_space<vmem>>, vector<8x256xf32>,
    return
  }
  func.func @transform_0(%arg0: i32) -> (i32, i32) {
    %c0_i32 = arith.constant 0 : i32
    %c0_i32_0 = arith.constant 0 : i32
    return %arg0, %c0_i32 : i32, i32
  }
  func.func @transform_1(%arg0: i32) -> (i32, i32) {
    %c0_i32 = arith.constant 0 : i32
    %c0_i32_0 = arith.constant 0 : i32
    return %arg0, %c0_i32 : i32, i32
  }
}

</mosaic_0001>

<bundles_post_ra>
// kernel: tpu_custom_call.1
= control target key start
LH: loop header
LB: loop body
LE: loop exit
PB: predicated region body
PF: predicated region fallthrough
CT: control target
= control target key end

     0   :  { %6 = vsyncpa [#allocation3], 0  ;;  %s134_s0 = inlined_call_operand.hbm [shape: f32[8,256], index: 0, kind: input, shape index: {}]   ;;  %s135_s1 = inlined_call_operand.hbm [shape: f32[8,256], index: 1, kind: output, shape index: {}]  }
   0x1   :  { %7 = vsyncpa [#allocation4], 0  ;;  %s98_s6 = smov [#allocation2]   ;;  %s50_s10 = scalar_lea.hbm %s134_s0, 256 }
   0x2   :  { %s14_s7 = sshll.u32 %s98_s6, 4  ;;  %p51_p0 = scmp.ne.s32.totalorder %s134_s0, %s50_s10  ;;  %s15_s7 = int_to_ptr.vmem [resolvable:$true] %s14_s7 }
   0x3   :  { %p54_p1 = scmp.lt.u32.totalorder %s50_s10, %s134_s0 }
   0x5   :  { %p56_p2 = pnand %p54_p1, %p51_p0 }
   0x7   :  { %59 = shalt.err (!%p56_p2)
}
   0x8   :  { %s60_s15 = scalar_lea.vmem %s15_s7, 256  ;;  %p65_p4 = scmp.lt.s32.totalorder %s15_s7, %s15_s7 }
   0x9   :  { %p61_p3 = scmp.ne.s32.totalorder %s15_s7, %s60_s15  ;;  %p66_p5 = scmp.lt.s32.totalorder %s60_s15, %s60_s15 }
   0xb   :  { %p67_p6 = por %p66_p5, %p65_p4 }
   0xd   :  { %p68_p7 = pnand %p67_p6, %p61_p3 }
   0xf   :  { %71 = shalt.err (!%p68_p7)
}
  0x10   :  { %17 = dma.hbm_to_vmem [thread:$0]  %s134_s0, 256, %s15_s7, [#allocation3]  }
  0x11   :  { %94 = dma.done.wait [#allocation3], 256  }
  0x12   :  { %95 = vsyncadd [#allocation3], 4294967040  ;;  %v21_v0 = vld [vmem:[#allocation2] sm:$0xff]  ;;  %v22_v1 = vld [vmem:[#allocation2 + $0x8] sm:$0xff]  ;;  %s99_s18 = smov [#allocation5]  }
  0x13   :  { %v23_v2 = vmul.f32 0.09, %v21_v0  ;;  %v24_v3 = vmul.f32 0.09, %v22_v1  ;;  %s39_s19 = sshll.u32 %s99_s18, 4  ;;  %s40_s19 = int_to_ptr.vmem [resolvable:$true] %s39_s19 }
  0x14   :  { %s72_s20 = scalar_lea.vmem %s40_s19, 256  ;;  %p77_p9 = scmp.lt.s32.totalorder %s40_s19, %s40_s19 }
  0x15   :  { %v25_v4 = vadd.f32 0.5, %v23_v2  ;;  %v26_v5 = vadd.f32 0.5, %v24_v3  ;;  %p73_p8 = scmp.ne.s32.totalorder %s40_s19, %s72_s20  ;;  %p78_p10 = scmp.lt.s32.totalorder %s72_s20, %s72_s20 }
  0x17   :  { %v27_v6 = vmul.f32 %v25_v4, %v21_v0  ;;  %v28_v7 = vmul.f32 %v26_v5, %v22_v1  ;;  %p79_p11 = por %p78_p10, %p77_p9 }
  0x19   :  { %v29_v8 = vadd.f32 0.47, %v27_v6  ;;  %v30_v9 = vadd.f32 0.47, %v28_v7  ;;  %p80_p12 = pnand %p79_p11, %p73_p8 }
  0x1b   :  { %31 = vst [vmem:[#allocation5] sm:$0xff] %v29_v8  ;;  %32 = vst [vmem:[#allocation5 + $0x8] sm:$0xff] %v30_v9 }
  0x1c   :  { %83 = shalt.err (!%p80_p12)
}
  0x1d   :  { %s84_s22 = scalar_lea.hbm %s135_s1, 256 }
  0x1e   :  { %p85_p13 = scmp.ne.s32.totalorder %s135_s1, %s84_s22  ;;  %p88_p0 = scmp.lt.u32.totalorder %s84_s22, %s135_s1 }
  0x20   :  { %p90_p1 = pnand %p88_p0, %p85_p13 }
  0x22   :  { %93 = shalt.err (!%p90_p1)
}
  0x23   :  { %42 = dma.vmem_to_hbm [thread:$0]  %s40_s19, 256, %s135_s1, [#allocation4]  }
  0x24   :  { %96 = dma.done.wait [#allocation4], 256  }
  0x25   :  { %97 = vsyncadd [#allocation4], 4294967040 }
  0x26   :  { %46 = vsyncpa [#allocation3], 1 }
  0x27   :  { %47 = vsyncpa [#allocation4], 1 }

</bundles_post_ra>
